<compile_context>
chip_gen: v6e
topology: v6e:2x2x1
jax: 0.10.0
libtpu: 0.0.40
codegen_flags: <defaults>
</compile_context>

<pallas_src>
import jax
import jax.numpy as jnp
from jax.experimental import pallas as pl
from jax.experimental.pallas import tpu as pltpu

_NEG_SLOPE = 0.01          # torch.nn.LeakyReLU default negative_slope
_PIX = 25
_HEAD = _PIX * _PIX        # 625
_HPAD = 640                # 625 rounded up to a 128-lane boundary


def _leaky_relu(v):
    # Identical to where(v>0, v, a*v) for 0 < a < 1, one VALU op cheaper.
    return jnp.maximum(v, _NEG_SLOPE * v)


def _joint_kernel(x_ref,
                  w1_ref, b1_ref, w2_ref, b2_ref, w3_ref, b3_ref, w4_ref, b4_ref,
                  wh_ref, bh_ref,
                  pi_ref, beta_ref):
    def layer(v_bf16, w_ref, b_ref):
        acc = jnp.dot(v_bf16, w_ref[...], preferred_element_type=jnp.float32)
        return _leaky_relu(acc + b_ref[...]).astype(jnp.bfloat16)

    # Four LeakyReLU linear layers: bf16 operands, f32 MXU accumulation,
    # f32 bias + activation, re-cast to bf16 for the next matmul.
    h = layer(x_ref[...], w1_ref, b1_ref)
    h = layer(h, w2_ref, b2_ref)
    h = layer(h, w3_ref, b3_ref)
    h = layer(h, w4_ref, b4_ref)

    # Fused pi/beta head: one (128, 1280) matmul (pi in cols [0,625),
    # SinglePixelLinear-folded beta in cols [640, 1265)).
    head = jnp.dot(h, wh_ref[...], preferred_element_type=jnp.float32) + bh_ref[...]

    z = head[:, :_HEAD]
    pi_ref[...] = pl.reciprocal(1.0 + jnp.exp(-z), approx=True)   # sigmoid on EUP
    beta_ref[...] = jnp.exp(head[:, _HPAD:_HPAD + _HEAD])


def _round_up(a, m):
    return ((a + m - 1) // m) * m


def joint_linear_generator(x, params, *, batch_tile=512):
    """Forward pass of JointLinearGenerator. Returns (pi, beta, std)."""
    x = jnp.asarray(x, jnp.float32)
    B, base_dim = x.shape

    f32 = lambda a: jnp.asarray(a, jnp.float32)
    bf16 = lambda a: jnp.asarray(a, jnp.float32).astype(jnp.bfloat16)
    bias = lambda a: jnp.asarray(a, jnp.float32).reshape(1, -1)

    # Fold SinglePixelLinear into the beta head (exact, it's linear):
    #   (h@Wb + bb) * w_sp + b_sp == h @ (Wb*w_sp) + (bb*w_sp + b_sp)
    wsp_flat = f32(params["w_sp"]).reshape(1, _HEAD)
    bsp_flat = f32(params["b_sp"]).reshape(1, _HEAD)
    wb_fold = f32(params["wb"]) * wsp_flat
    bb_fold = bias(params["bb"]) * wsp_flat + bsp_flat

    # Concatenate both heads into one lane-aligned (128, 1280) weight / bias.
    w_head = jnp.zeros((128, 2 * _HPAD), jnp.float32)
    w_head = w_head.at[:, :_HEAD].set(f32(params["wpi"]))
    w_head = w_head.at[:, _HPAD:_HPAD + _HEAD].set(wb_fold)
    b_head = jnp.zeros((1, 2 * _HPAD), jnp.float32)
    b_head = b_head.at[:, :_HEAD].set(bias(params["bpi"]))
    b_head = b_head.at[:, _HPAD:_HPAD + _HEAD].set(bb_fold)

    weights = [
        bf16(params["w1"]), bias(params["b1"]),
        bf16(params["w2"]), bias(params["b2"]),
        bf16(params["w3"]), bias(params["b3"]),
        bf16(params["w4"]), bias(params["b4"]),
        w_head.astype(jnp.bfloat16), b_head,
    ]

    # Batch tiling: at least 2 grid blocks whenever B > 8 so the "parallel"
    # axis can shard across v7x's two TensorCores; ragged last block (all math
    # is row-independent, so no pad/slice round trip is needed).
    if B <= 8:
        bm = B
    else:
        bm = min(batch_tile, _round_up(-(-B // 2), 8))
    grid = (pl.cdiv(B, bm),)

    def resident(shape):
        nd = len(shape)
        return pl.BlockSpec(shape, lambda i, _nd=nd: (0,) * _nd)

    def row_spec(d):
        return pl.BlockSpec((bm, d), lambda i: (i, 0))

    flops = 2 * B * (base_dim * 32 + 32 * 128 + 128 * 256 + 256 * 128
                     + 128 * 2 * _HPAD)
    transcendentals = 2 * B * _HEAD                       # sigmoid + exp heads
    bytes_accessed = (2 * B * base_dim                    # x (bf16)
                      + sum(int(w.size) * jnp.dtype(w.dtype).itemsize
                            for w in weights)
                      + 2 * B * _HEAD * 4)                # pi + beta (f32)

    pi, beta_flat = pl.pallas_call(
        _joint_kernel,
        out_shape=(jax.ShapeDtypeStruct((B, _HEAD), jnp.float32),
                   jax.ShapeDtypeStruct((B, _HEAD), jnp.float32)),
        grid_spec=pltpu.PrefetchScalarGridSpec(
            num_scalar_prefetch=0,
            grid=grid,
            in_specs=[row_spec(base_dim)] + [resident(w.shape) for w in weights],
            out_specs=[row_spec(_HEAD), row_spec(_HEAD)],
        ),
        compiler_params=pltpu.CompilerParams(
            dimension_semantics=("parallel",),
        ),
        cost_estimate=pl.CostEstimate(
            flops=flops,
            transcendentals=transcendentals,
            bytes_accessed=bytes_accessed),
    )(x.astype(jnp.bfloat16), *weights)

    beta = beta_flat.reshape(-1, _PIX, _PIX)
    # std is a constant-ones tensor: return a broadcast constant instead of
    # writing a third full-size HBM stream from the kernel.
    std = jnp.broadcast_to(jnp.ones((), beta.dtype), beta.shape)
    return pi, beta, std


def reference(x, params):
    """Pure-JAX f32 reference of the PyTorch forward."""
    lr = lambda v: jnp.where(v > 0, v, _NEG_SLOPE * v)
    h = lr(x @ params["w1"] + params["b1"])
    h = lr(h @ params["w2"] + params["b2"])
    h = lr(h @ params["w3"] + params["b3"])
    h = lr(h @ params["w4"] + params["b4"])
    pi = jax.nn.sigmoid(h @ params["wpi"] + params["bpi"])
    beta = (h @ params["wb"] + params["bb"]).reshape(-1, _PIX, _PIX)
    beta = jnp.exp(beta * params["w_sp"] + params["b_sp"])
    std = jnp.ones_like(beta)
    return pi, beta, std


if __name__ == "__main__":
    key = jax.random.PRNGKey(0)
    base_dim = 32
    batch = 2

    ks = jax.random.split(key, 14)
    scale = 0.05

    def w(k, shape):
        return scale * jax.random.normal(k, shape, dtype=jnp.float32)

    params = {
        "w1": w(ks[0], (base_dim, 32)),  "b1": w(ks[1], (32,)),
        "w2": w(ks[2], (32, 128)),       "b2": w(ks[3], (128,)),
        "w3": w(ks[4], (128, 256)),      "b3": w(ks[5], (256,)),
        "w4": w(ks[6], (256, 128)),      "b4": w(ks[7], (128,)),
        "wpi": w(ks[8], (128, _HEAD)),   "bpi": w(ks[9], (_HEAD,)),
        "wb": w(ks[10], (128, _HEAD)),   "bb": w(ks[11], (_HEAD,)),
        # SinglePixelLinear.__init__: W = ones(25,25), bias = ones(25,25)
        "w_sp": jnp.ones((_PIX, _PIX), jnp.float32),
        "b_sp": jnp.ones((_PIX, _PIX), jnp.float32),
    }

    x = jax.random.normal(ks[12], (batch, base_dim), dtype=jnp.float32)

    pi, beta, std = joint_linear_generator(x, params)
    (pi, beta, std) = jax.block_until_ready((pi, beta, std))

    pi_ref, beta_ref, std_ref = reference(x, params)

    assert pi.shape == (batch, _HEAD) and pi.dtype == jnp.float32
    assert beta.shape == (batch, _PIX, _PIX) and beta.dtype == jnp.float32
    assert std.shape == (batch, _PIX, _PIX)
    assert jnp.allclose(pi, pi_ref, atol=1e-2, rtol=1e-2), "pi mismatch vs reference"
    assert jnp.allclose(beta, beta_ref, atol=1e-2, rtol=1e-2), "beta mismatch vs reference"
    assert jnp.allclose(std, std_ref), "std mismatch vs reference"

    print("KERNEL_OK")
</pallas_src>

<mosaic_0001>
module attributes {stable_mosaic.version = 11 : i64} {
  func.func @_joint_kernel(%arg0: i32, %arg1: memref<2x32xbf16, #tpu.memory_space<vmem>>, %arg2: memref<32x32xbf16, #tpu.memory_space<vmem>>, %arg3: memref<1x32xf32, #tpu.memory_space<vmem>>, %arg4: memref<32x128xbf16, #tpu.memory_space<vmem>>, %arg5: memref<1x128xf32, #tpu.memory_space<vmem>>, %arg6: memref<128x256xbf16, #tpu.memory_space<vmem>>, %arg7: memref<1x256xf32, #tpu.memory_space<vmem>>, %arg8: memref<256x128xbf16, #tpu.memory_space<vmem>>, %arg9: memref<1x128xf32, #tpu.memory_space<vmem>>, %arg10: memref<128x1280xbf16, #tpu.memory_space<vmem>>, %arg11: memref<1x1280xf32, #tpu.memory_space<vmem>>, %arg12: memref<2x625xf32, #tpu.memory_space<vmem>>, %arg13: memref<2x625xf32, #tpu.memory_space<vmem>>) attributes {dimension_semantics = [#tpu.dimension_semantics<parallel>], iteration_bounds = array<i64: 1>, scalar_prefetch = 0 : i64, scratch_operands = 0 : i64, tpu.core_type = #tpu.core_type<tc>, window_params = [{transform_indices = @transform_0, window_bounds = array<i64: 2, 32>}, {pipeline_mode = #tpu.pipeline_mode<synchronous>, transform_indices = @transform_1, window_bounds = array<i64: 32, 32>}, {pipeline_mode = #tpu.pipeline_mode<synchronous>, transform_indices = @transform_2, window_bounds = array<i64: 1, 32>}, {pipeline_mode = #tpu.pipeline_mode<synchronous>, transform_indices = @transform_3, window_bounds = array<i64: 32, 128>}, {pipeline_mode = #tpu.pipeline_mode<synchronous>, transform_indices = @transform_4, window_bounds = array<i64: 1, 128>}, {pipeline_mode = #tpu.pipeline_mode<synchronous>, transform_indices = @transform_5, window_bounds = array<i64: 128, 256>}, {pipeline_mode = #tpu.pipeline_mode<synchronous>, transform_indices = @transform_6, window_bounds = array<i64: 1, 256>}, {pipeline_mode = #tpu.pipeline_mode<synchronous>, transform_indices = @transform_7, window_bounds = array<i64: 256, 128>}, {pipeline_mode = #tpu.pipeline_mode<synchronous>, transform_indices = @transform_8, window_bounds = array<i64: 1, 128>}, {pipeline_mode = #tpu.pipeline_mode<synchronous>, transform_indices = @transform_9, window_bounds = array<i64: 128, 1280>}, {pipeline_mode = #tpu.pipeline_mode<synchronous>, transform_indices = @transform_10, window_bounds = array<i64: 1, 1280>}, {transform_indices = @transform_11, window_bounds = array<i64: 2, 625>}, {transform_indices = @transform_12, window_bounds = array<i64: 2, 625>}]} {
    %c0 = arith.constant 0 : index
    %c0_0 = arith.constant 0 : index
    %0 = vector.load %arg1[%c0, %c0_0] : memref<2x32xbf16, #tpu.memory_space<vmem>>, vector<2x32xbf16>
    %c0_1 = arith.constant 0 : index
    %c0_2 = arith.constant 0 : index
    %1 = vector.load %arg2[%c0_1, %c0_2] : memref<32x32xbf16, #tpu.memory_space<vmem>>, vector<32x32xbf16>
    %cst = arith.constant dense<0.000000e+00> : vector<2x32xf32>
    %2 = tpu.matmul %0, %1, %cst {dimension_numbers = #tpu.dot_dimension_numbers<[1], [0], [0], [1], [0, 0, 1, 1], [], []>} : vector<2x32xbf16>, vector<32x32xbf16>, vector<2x32xf32> -> vector<2x32xf32>
    %c0_3 = arith.constant 0 : index
    %c0_4 = arith.constant 0 : index
    %3 = vector.load %arg3[%c0_3, %c0_4] : memref<1x32xf32, #tpu.memory_space<vmem>>, vector<1x32xf32>
    %4 = vector.broadcast %3 : vector<1x32xf32> to vector<2x32xf32>
    %5 = arith.addf %2, %4 : vector<2x32xf32>
    %cst_5 = arith.constant 0.00999999977 : f32
    %6 = vector.broadcast %cst_5 : f32 to vector<2x32xf32>
    %7 = arith.mulf %6, %5 : vector<2x32xf32>
    %8 = arith.maximumf %5, %7 : vector<2x32xf32>
    %9 = arith.truncf %8 : vector<2x32xf32> to vector<2x32xbf16>
    %c0_6 = arith.constant 0 : index
    %c0_7 = arith.constant 0 : index
    %10 = vector.load %arg4[%c0_6, %c0_7] : memref<32x128xbf16, #tpu.memory_space<vmem>>, vector<32x128xbf16>
    %cst_8 = arith.constant dense<0.000000e+00> : vector<2x128xf32>
    %11 = tpu.matmul %9, %10, %cst_8 {dimension_numbers = #tpu.dot_dimension_numbers<[1], [0], [0], [1], [0, 0, 1, 1], [], []>} : vector<2x32xbf16>, vector<32x128xbf16>, vector<2x128xf32> -> vector<2x128xf32>
    %c0_9 = arith.constant 0 : index
    %c0_10 = arith.constant 0 : index
    %12 = vector.load %arg5[%c0_9, %c0_10] : memref<1x128xf32, #tpu.memory_space<vmem>>, vector<1x128xf32>
    %13 = vector.broadcast %12 : vector<1x128xf32> to vector<2x128xf32>
    %14 = arith.addf %11, %13 : vector<2x128xf32>
    %cst_11 = arith.constant 0.00999999977 : f32
    %15 = vector.broadcast %cst_11 : f32 to vector<2x128xf32>
    %16 = arith.mulf %15, %14 : vector<2x128xf32>
    %17 = arith.maximumf %14, %16 : vector<2x128xf32>
    %18 = arith.truncf %17 : vector<2x128xf32> to vector<2x128xbf16>
    %c0_12 = arith.constant 0 : index
    %c0_13 = arith.constant 0 : index
    %19 = vector.load %arg6[%c0_12, %c0_13] : memref<128x256xbf16, #tpu.memory_space<vmem>>, vector<128x256xbf16>
    %cst_14 = arith.constant dense<0.000000e+00> : vector<2x256xf32>
    %20 = tpu.matmul %18, %19, %cst_14 {dimension_numbers = #tpu.dot_dimension_numbers<[1], [0], [0], [1], [0, 0, 1, 1], [], []>} : vector<2x128xbf16>, vector<128x256xbf16>, vector<2x256xf32> -> vector<2x256xf32>
    %c0_15 = arith.constant 0 : index
    %c0_16 = arith.constant 0 : index
    %21 = vector.load %arg7[%c0_15, %c0_16] : memref<1x256xf32, #tpu.memory_space<vmem>>, vector<1x256xf32>
    %22 = vector.broadcast %21 : vector<1x256xf32> to vector<2x256xf32>
    %23 = arith.addf %20, %22 : vector<2x256xf32>
    %cst_17 = arith.constant 0.00999999977 : f32
    %24 = vector.broadcast %cst_17 : f32 to vector<2x256xf32>
    %25 = arith.mulf %24, %23 : vector<2x256xf32>
    %26 = arith.maximumf %23, %25 : vector<2x256xf32>
    %27 = arith.truncf %26 : vector<2x256xf32> to vector<2x256xbf16>
    %c0_18 = arith.constant 0 : index
    %c0_19 = arith.constant 0 : index
    %28 = vector.load %arg8[%c0_18, %c0_19] : memref<256x128xbf16, #tpu.memory_space<vmem>>, vector<256x128xbf16>
    %cst_20 = arith.constant dense<0.000000e+00> : vector<2x128xf32>
    %29 = tpu.matmul %27, %28, %cst_20 {dimension_numbers = #tpu.dot_dimension_numbers<[1], [0], [0], [1], [0, 0, 1, 1], [], []>} : vector<2x256xbf16>, vector<256x128xbf16>, vector<2x128xf32> -> vector<2x128xf32>
    %c0_21 = arith.constant 0 : index
    %c0_22 = arith.constant 0 : index
    %30 = vector.load %arg9[%c0_21, %c0_22] : memref<1x128xf32, #tpu.memory_space<vmem>>, vector<1x128xf32>
    %31 = vector.broadcast %30 : vector<1x128xf32> to vector<2x128xf32>
    %32 = arith.addf %29, %31 : vector<2x128xf32>
    %cst_23 = arith.constant 0.00999999977 : f32
    %33 = vector.broadcast %cst_23 : f32 to vector<2x128xf32>
    %34 = arith.mulf %33, %32 : vector<2x128xf32>
    %35 = arith.maximumf %32, %34 : vector<2x128xf32>
    %36 = arith.truncf %35 : vector<2x128xf32> to vector<2x128xbf16>
    %c0_24 = arith.constant 0 : index
    %c0_25 = arith.constant 0 : index
    %37 = vector.load %arg10[%c0_24, %c0_25] : memref<128x1280xbf16, #tpu.memory_space<vmem>>, vector<128x1280xbf16>
    %cst_26 = arith.constant dense<0.000000e+00> : vector<2x1280xf32>
    %38 = tpu.matmul %36, %37, %cst_26 {dimension_numbers = #tpu.dot_dimension_numbers<[1], [0], [0], [1], [0, 0, 1, 1], [], []>} : vector<2x128xbf16>, vector<128x1280xbf16>, vector<2x1280xf32> -> vector<2x1280xf32>
    %c0_27 = arith.constant 0 : index
    %c0_28 = arith.constant 0 : index
    %39 = vector.load %arg11[%c0_27, %c0_28] : memref<1x1280xf32, #tpu.memory_space<vmem>>, vector<1x1280xf32>
    %40 = vector.broadcast %39 : vector<1x1280xf32> to vector<2x1280xf32>
    %41 = arith.addf %38, %40 : vector<2x1280xf32>
    %42 = vector.extract_strided_slice %41 {offsets = [0, 0], sizes = [2, 625], strides = [1, 1]} : vector<2x1280xf32> to vector<2x625xf32>
    %cst_29 = arith.constant 0.000000e+00 : f32
    %43 = vector.broadcast %cst_29 : f32 to vector<2x625xf32>
    %44 = arith.subf %43, %42 : vector<2x625xf32>
    %45 = math.exp %44 : vector<2x625xf32>
    %cst_30 = arith.constant 1.000000e+00 : f32
    %46 = vector.broadcast %cst_30 : f32 to vector<2x625xf32>
    %47 = arith.addf %46, %45 : vector<2x625xf32>
    %48 = tpu.reciprocal %47 {approx = true} : vector<2x625xf32> -> vector<2x625xf32>
    %c0_31 = arith.constant 0 : index
    %c0_32 = arith.constant 0 : index
    %49 = vector.load %arg12[%c0_31, %c0_32] : memref<2x625xf32, #tpu.memory_space<vmem>>, vector<2x625xf32>
    tpu.vector_store %arg12[%c0_31, %c0_32], %48 {strides = array<i32>} : memref<2x625xf32, #tpu.memory_space<vmem>>, vector<2x625xf32>,
    %50 = vector.extract_strided_slice %41 {offsets = [0, 640], sizes = [2, 625], strides = [1, 1]} : vector<2x1280xf32> to vector<2x625xf32>
    %51 = math.exp %50 : vector<2x625xf32>
    %c0_33 = arith.constant 0 : index
    %c0_34 = arith.constant 0 : index
    %52 = vector.load %arg13[%c0_33, %c0_34] : memref<2x625xf32, #tpu.memory_space<vmem>>, vector<2x625xf32>
    tpu.vector_store %arg13[%c0_33, %c0_34], %51 {strides = array<i32>} : memref<2x625xf32, #tpu.memory_space<vmem>>, vector<2x625xf32>,
    return
  }
  func.func @transform_0(%arg0: i32) -> (i32, i32) {
    %c0_i32 = arith.constant 0 : i32
    %c0_i32_0 = arith.constant 0 : i32
    return %arg0, %c0_i32 : i32, i32
  }
  func.func @transform_1(%arg0: i32) -> (i32, i32) {
    %c0_i32 = arith.constant 0 : i32
    %c0_i32_0 = arith.constant 0 : i32
    %c0_i32_1 = arith.constant 0 : i32
    return %c0_i32, %c0_i32_0 : i32, i32
  }
  func.func @transform_2(%arg0: i32) -> (i32, i32) {
    %c0_i32 = arith.constant 0 : i32
    %c0_i32_0 = arith.constant 0 : i32
    %c0_i32_1 = arith.constant 0 : i32
    return %c0_i32, %c0_i32_0 : i32, i32
  }
  func.func @transform_3(%arg0: i32) -> (i32, i32) {
    %c0_i32 = arith.constant 0 : i32
    %c0_i32_0 = arith.constant 0 : i32
    %c0_i32_1 = arith.constant 0 : i32
    return %c0_i32, %c0_i32_0 : i32, i32
  }
  func.func @transform_4(%arg0: i32) -> (i32, i32) {
    %c0_i32 = arith.constant 0 : i32
    %c0_i32_0 = arith.constant 0 : i32
    %c0_i32_1 = arith.constant 0 : i32
    return %c0_i32, %c0_i32_0 : i32, i32
  }
  func.func @transform_5(%arg0: i32) -> (i32, i32) {
    %c0_i32 = arith.constant 0 : i32
    %c0_i32_0 = arith.constant 0 : i32
    %c0_i32_1 = arith.constant 0 : i32
    return %c0_i32, %c0_i32_0 : i32, i32
  }
  func.func @transform_6(%arg0: i32) -> (i32, i32) {
    %c0_i32 = arith.constant 0 : i32
    %c0_i32_0 = arith.constant 0 : i32
    %c0_i32_1 = arith.constant 0 : i32
    return %c0_i32, %c0_i32_0 : i32, i32
  }
  func.func @transform_7(%arg0: i32) -> (i32, i32) {
    %c0_i32 = arith.constant 0 : i32
    %c0_i32_0 = arith.constant 0 : i32
    %c0_i32_1 = arith.constant 0 : i32
    return %c0_i32, %c0_i32_0 : i32, i32
  }
  func.func @transform_8(%arg0: i32) -> (i32, i32) {
    %c0_i32 = arith.constant 0 : i32
    %c0_i32_0 = arith.constant 0 : i32
    %c0_i32_1 = arith.constant 0 : i32
    return %c0_i32, %c0_i32_0 : i32, i32
  }
  func.func @transform_9(%arg0: i32) -> (i32, i32) {
    %c0_i32 = arith.constant 0 : i32
    %c0_i32_0 = arith.constant 0 : i32
    %c0_i32_1 = arith.constant 0 : i32
    return %c0_i32, %c0_i32_0 : i32, i32
  }
  func.func @transform_10(%arg0: i32) -> (i32, i32) {
    %c0_i32 = arith.constant 0 : i32
    %c0_i32_0 = arith.constant 0 : i32
    %c0_i32_1 = arith.constant 0 : i32
    return %c0_i32, %c0_i32_0 : i32, i32
  }
  func.func @transform_11(%arg0: i32) -> (i32, i32) {
    %c0_i32 = arith.constant 0 : i32
    %c0_i32_0 = arith.constant 0 : i32
    return %arg0, %c0_i32 : i32, i32
  }
  func.func @transform_12(%arg0: i32) -> (i32, i32) {
    %c0_i32 = arith.constant 0 : i32
    %c0_i32_0 = arith.constant 0 : i32
    return %arg0, %c0_i32 : i32, i32
  }
}

</mosaic_0001>

<bundles_post_ra>
// kernel: tpu_custom_call.1
= control target key start
LH: loop header
LB: loop body
LE: loop exit
PB: predicated region body
PF: predicated region fallthrough
CT: control target
= control target key end

     0   :  { %18 = vsyncpa [#allocation3], 0  ;;  %s2208_s0 = inlined_call_operand.hbm [shape: bf16[2,32], index: 0, kind: input, shape index: {}]   ;;  %s2209_s1 = inlined_call_operand.hbm [shape: bf16[32,32], index: 1, kind: input, shape index: {}]   ;;  %s2210_s2 = inlined_call_operand.vmem [shape: f32[1,32], index: 2, kind: input, shape index: {}]   ;;  %s2211_s3 = inlined_call_operand.hbm [shape: bf16[32,128], index: 3, kind: input, shape index: {}]   ;;  %s2212_s4 = inlined_call_operand.vmem [shape: f32[1,128], index: 4, kind: input, shape index: {}]   ;;  %s2213_s5 = inlined_call_operand.hbm [shape: bf16[128,256], index: 5, kind: input, shape index: {}]   ;;  %s2214_s6 = inlined_call_operand.vmem [shape: f32[1,256], index: 6, kind: input, shape index: {}]   ;;  %s2215_s7 = inlined_call_operand.hbm [shape: bf16[256,128], index: 7, kind: input, shape index: {}]   ;;  %s2216_s8 = inlined_call_operand.vmem [shape: f32[1,128], index: 8, kind: input, shape index: {}]   ;;  %s2217_s9 = inlined_call_operand.hbm [shape: bf16[128,1280], index: 9, kind: input, shape index: {}]   ;;  %s2218_s10 = inlined_call_operand.vmem [shape: f32[1,1280], index: 10, kind: input, shape index: {}]   ;;  %s2219_s11 = inlined_call_operand.hbm [shape: f32[2,625], index: 11, kind: output, shape index: {0}]   ;;  %s2220_s12 = inlined_call_operand.hbm [shape: f32[2,625], index: 12, kind: output, shape index: {1}]  }
   0x1   :  { %19 = vsyncpa [#allocation6], 0 }
   0x2   :  { %20 = vsyncpa [#allocation9], 0 }
   0x3   :  { %21 = vsyncpa [#allocation12], 0 }
   0x4   :  { %22 = vsyncpa [#allocation4], 0 }
   0x5   :  { %23 = vsyncpa [#allocation15], 0  ;;  %s2018_s21 = smov [#allocation5]  }
   0x6   :  { %s39_s22 = sshll.u32 %s2018_s21, 4  ;;  %s40_s22 = int_to_ptr.vmem [resolvable:$true] %s39_s22 }
   0x7   :  { %s1854_s23 = scalar_lea.vmem %s40_s22, 256  ;;  %p1859_p1 = scmp.lt.s32.totalorder %s40_s22, %s40_s22 }
   0x8   :  { %p1855_p0 = scmp.ne.s32.totalorder %s40_s22, %s1854_s23  ;;  %p1860_p2 = scmp.lt.s32.totalorder %s1854_s23, %s1854_s23 }
   0xa   :  { %p1861_p3 = por %p1860_p2, %p1859_p1 }
   0xc   :  { %p1862_p4 = pnand %p1861_p3, %p1855_p0 }
   0xe   :  { %1865 = shalt.err (!%p1862_p4)
}
   0xf   :  { %s2019_s24 = smov 64   ;;  %s2020_s25 = smov 4  }
  0x10   :  { %45 = dma.hbm_to_vmem [thread:$0]  %s2209_s1, 256, %s40_s22, [#allocation6], %s2019_s24, %s2019_s24, %s2020_s25  }
  0x11   :  { %s2021_s28 = smov [#allocation8]  }
  0x12   :  { %s67_s29 = sshll.u32 %s2021_s28, 4  ;;  %s68_s29 = int_to_ptr.vmem [resolvable:$true] %s67_s29 }
  0x13   :  { %s1874_s30 = scalar_lea.vmem %s68_s29, 2048  ;;  %p1879_p6 = scmp.lt.s32.totalorder %s68_s29, %s68_s29 }
  0x14   :  { %p1875_p5 = scmp.ne.s32.totalorder %s68_s29, %s1874_s30  ;;  %p1880_p7 = scmp.lt.s32.totalorder %s1874_s30, %s1874_s30 }
  0x16   :  { %p1881_p8 = por %p1880_p7, %p1879_p6 }
  0x18   :  { %p1882_p9 = pnand %p1881_p8, %p1875_p5 }
  0x1a   :  { %1885 = shalt.err (!%p1882_p9)
}
  0x1b   :  { %s2022_s13 = smov 128   ;;  %s2023_s14 = smov 8  }
  0x1c   :  { %73 = dma.hbm_to_vmem [thread:$0]  %s2213_s5, 2048, %s68_s29, [#allocation9], %s2022_s13, %s2022_s13, %s2023_s14  }
  0x1d   :  { %s2024_s17 = smov [#allocation2]   ;;  %s2025_s19 = smov [#allocation7]  }
  0x1e   :  { %s30_s18 = sshll.u32 %s2024_s17, 4  ;;  %s53_s1 = sshll.u32 %s2025_s19, 4  ;;  %s31_s18 = int_to_ptr.vmem [resolvable:$true] %s30_s18  ;;  %s54_s1 = int_to_ptr.vmem [resolvable:$true] %s53_s1 }
  0x1f   :  { %s1894_s20 = scalar_lea.vmem %s31_s18, 16  ;;  %s1898_s21 = scalar_lea.vmem %s31_s18, 32 }
  0x20   :  { %p1895_p10 = scmp.ne.s32.totalorder %s31_s18, %s1894_s20  ;;  %p1899_p11 = scmp.lt.s32.totalorder %s31_s18, %s31_s18 }
  0x21   :  { %p1900_p12 = scmp.lt.s32.totalorder %s1898_s21, %s1894_s20 }
  0x23   :  { %p1901_p13 = por %p1900_p12, %p1899_p11 }
  0x25   :  { %p1902_p0 = pnand %p1901_p13, %p1895_p10 }
  0x27   :  { %1905 = shalt.err (!%p1902_p0)
}
  0x28   :  { %33 = dma.hbm_to_vmem [thread:$0]  %s2208_s0, 16, %s31_s18, [#allocation3]  }
  0x29   :  { %s1914_s26 = scalar_lea.vmem %s54_s1, 256  ;;  %p1919_p2 = scmp.lt.s32.totalorder %s54_s1, %s54_s1 }
  0x2a   :  { %p1915_p1 = scmp.ne.s32.totalorder %s54_s1, %s1914_s26  ;;  %p1920_p3 = scmp.lt.s32.totalorder %s1914_s26, %s1914_s26 }
  0x2c   :  { %p1921_p4 = por %p1920_p3, %p1919_p2 }
  0x2e   :  { %p1922_p5 = pnand %p1921_p4, %p1915_p1 }
  0x30   :  { %1925 = shalt.err (!%p1922_p5)
}
  0x31   :  { %59 = dma.hbm_to_vmem [thread:$0]  %s2211_s3, 256, %s54_s1, [#allocation6], %s2019_s24, %s2019_s24, %s2020_s25  }
  0x32   :  { %s2026_s28 = smov [#allocation10]   ;;  %s2027_s30 = smov [#allocation11]  }
  0x33   :  { %s81_s29 = sshll.u32 %s2026_s28, 4  ;;  %s95_s13 = sshll.u32 %s2027_s30, 4  ;;  %s82_s29 = int_to_ptr.vmem [resolvable:$true] %s81_s29  ;;  %s96_s13 = int_to_ptr.vmem [resolvable:$true] %s95_s13 }
  0x34   :  { %s1934_s0 = scalar_lea.vmem %s82_s29, 2048  ;;  %p1939_p7 = scmp.lt.s32.totalorder %s82_s29, %s82_s29 }
  0x35   :  { %p1935_p6 = scmp.ne.s32.totalorder %s82_s29, %s1934_s0  ;;  %p1940_p8 = scmp.lt.s32.totalorder %s1934_s0, %s1934_s0 }
  0x37   :  { %p1941_p9 = por %p1940_p8, %p1939_p7 }
  0x39   :  { %p1942_p10 = pnand %p1941_p9, %p1935_p6 }
  0x3b   :  { %1945 = shalt.err (!%p1942_p10)
}
  0x3c   :  { %87 = dma.hbm_to_vmem [thread:$0]  %s2215_s7, 2048, %s82_s29, [#allocation9], %s2019_s24, %s2019_s24, %s2020_s25  }
  0x3d   :  { %s1954_s3 = scalar_lea.vmem %s96_s13, 10240  ;;  %p1959_p12 = scmp.lt.s32.totalorder %s96_s13, %s96_s13 }
  0x3e   :  { %p1955_p11 = scmp.ne.s32.totalorder %s96_s13, %s1954_s3  ;;  %p1960_p13 = scmp.lt.s32.totalorder %s1954_s3, %s1954_s3 }
  0x40   :  { %p1961_p0 = por %p1960_p13, %p1959_p12 }
  0x42   :  { %p1962_p1 = pnand %p1961_p0, %p1955_p11 }
  0x44   :  { %1965 = shalt.err (!%p1962_p1)
}
  0x45   :  { %s2028_s16 = smov 640   ;;  %s2029_s17 = smov 40  }
  0x46   :  { %101 = dma.hbm_to_vmem [thread:$0]  %s2217_s9, 10240, %s96_s13, [#allocation12], %s2028_s16, %s2028_s16, %s2029_s17  }
  0x47   :  { %2006 = dma.done.wait [#allocation3], 16  }
  0x48   :  { %2007 = vsyncadd [#allocation3], 4294967280 }
  0x49   :  { %2008 = dma.done.wait [#allocation6], 512  }
  0x4a   :  { %2009 = vsyncadd [#allocation6], 4294966784 }
  0x4b   :  { %2010 = dma.done.wait [#allocation9], 4096  }
  0x4c   :  { %2011 = vsyncadd [#allocation9], 4294963200 }
  0x4d   :  { %2012 = dma.done.wait [#allocation12], 10240  }
  0x4e   :  { %2013 = vsyncadd [#allocation12], 4294957056  ;;  %v2030_v0 = vmov 0.0   ;;  %vm2031_vm0 = vmmov 0   ;;  %v1652_v1 = vld [vmem:[#allocation5 + $0x8] sm:$0xff]   ;;  %v1653_v2 = vld [vmem:[#allocation5] sm:$0xff]  }
  0x4f   :  { %1618 = vmatprep.subr.bf16.mxu1 %v2030_v0  ;;  %1622 = vmatprep.mubr.msk.bf16.mxu1 %vm2031_vm0, %v2030_v0  ;;  %v123_v3 = vld [vmem:[#allocation2] sm:$0x1]  ;;  %vm147_vm1 = vcmask 261120   ;;  %v1655_v5 = vld [vmem:[#allocation7] sm:$0xff]   ;;  %v1659_v8 = vld [vmem:[#allocation8 + $0x64] ss:$8 sps:$4 sm:$0xff]  }
  0x50   :  { %1619 = vmatpush3.bf16.msra.mxu1 %v1652_v1  ;;  %v1654_v4 = vld [vmem:[#allocation7 + $0x8] sm:$0xff]   ;;  %v1661_v9 = vld [vmem:[#allocation8 + $0x60] ss:$8 sps:$4 sm:$0xff]   ;;  %v1665_v12 = vld [vmem:[#allocation8 + $0x44] ss:$8 sps:$4 sm:$0xff]   ;;  %v2032_v31 = vmov 0  }
  0x51   :  { %1620 = vmatprep.subr.bf16.mxu1 %v2030_v0  ;;  %v1656_v6 = vld [vmem:[#allocation8 + $0x74] ss:$8 sps:$4 sm:$0xff]   ;;  %v1658_v7 = vld [vmem:[#allocation8 + $0x70] ss:$8 sps:$4 sm:$0xff]   ;;  %v1667_v13 = vld [vmem:[#allocation8 + $0x40] ss:$8 sps:$4 sm:$0xff]   ;;  %403 = vmatprep.mubr.bf16.mxu0 %v2032_v31 }
  0x52   :  { %371 = vmatprep.subr.bf16.mxu0 %v1656_v6  ;;  %v1662_v10 = vld [vmem:[#allocation8 + $0x54] ss:$8 sps:$4 sm:$0xff]   ;;  %v1664_v11 = vld [vmem:[#allocation8 + $0x50] ss:$8 sps:$4 sm:$0xff]   ;;  %v1671_v16 = vld [vmem:[#allocation8 + $0x24] ss:$8 sps:$4 sm:$0xff]  }
  0x53   :  { %372 = vmatpush1.bf16.msra.mxu0 %v1658_v7  ;;  %v1668_v14 = vld [vmem:[#allocation8 + $0x34] ss:$8 sps:$4 sm:$0xff]   ;;  %v1670_v15 = vld [vmem:[#allocation8 + $0x30] ss:$8 sps:$4 sm:$0xff]   ;;  %v1673_v17 = vld [vmem:[#allocation8 + $0x20] ss:$8 sps:$4 sm:$0xff]  }
  0x54   :  { %1621 = vmatpush3.bf16.msra.mxu1 %v1653_v2  ;;  %373 = vmatprep.subr.bf16.mxu0 %v1659_v8  ;;  %v1469_v18 = vld [vmem:[%s2210_s2] ss:$0 sm:$0xff]  ;;  %v1676_v28 = vld [vmem:[#allocation8 + $0x10] ss:$8 sps:$4 sm:$0xff]   ;;  %v1677_v29 = vld [vmem:[#allocation8 + $0x4] ss:$8 sps:$4 sm:$0xff]  }
  0x55   :  { %1626 = vmatprep.subr.bf16.mxu1 %v2030_v0  ;;  %v1674_v27 = vld [vmem:[#allocation8 + $0x14] ss:$8 sps:$4 sm:$0xff]   ;;  %v1679_v30 = vld [vmem:[#allocation8] ss:$8 sps:$4 sm:$0xff]   ;;  %v1696_v57 = vld [vmem:[#allocation11 + $0x230] ss:$40 sps:$4 sm:$0xff]  }
  0x56   :  { %v1680_v32 = vld [vmem:[#allocation10 + $0x78] sm:$0xff]   ;;  %v1682_v34 = vld [vmem:[#allocation10 + $0x70] sm:$0xff]   ;;  %v1684_v36 = vld [vmem:[#allocation10 + $0x68] sm:$0xff]   ;;  %s2034_s23 = smov [#allocation13]   ;;  %vm1392_vm2 = vcmask 918528  }
  0x57   :  { %1623 = vmatmul.mubr.msk.bf16.vlgmr.msra.gmra.mxu1 %vm147_vm1, %v123_v3  ;;  %374 = vmatpush1.bf16.msra.mxu0 %v1661_v9  ;;  %v1681_v33 = vld [vmem:[#allocation10 + $0x38] sm:$0xff]   ;;  %v1683_v35 = vld [vmem:[#allocation10 + $0x30] sm:$0xff]   ;;  %v1685_v37 = vld [vmem:[#allocation10 + $0x28] sm:$0xff]   ;;  %s1443_s26 = sshll.u32 %s2034_s23, 4  ;;  %s1444_s26 = int_to_ptr.vmem [resolvable:$true] %s1443_s26 }
  0x58   :  { %1630 = vmatprep.mubr.msk.bf16.mxu1 %vm2031_vm0, %v2030_v0  ;;  %1627 = vmatpush3.bf16.msra.mxu1 %v1654_v4  ;;  %v1686_v38 = vld [vmem:[#allocation10 + $0x60] sm:$0xff]   ;;  %v1688_v40 = vld [vmem:[#allocation10 + $0x58] sm:$0xff]   ;;  %v1690_v51 = vld [vmem:[#allocation10 + $0x50] sm:$0xff]   ;;  %v281_v4 = vlaneseq  ;;  %p1971_p3 = scmp.lt.s32.totalorder %s1444_s26, %s1444_s26 }
  0x59   :  { %1628 = vmatprep.subr.bf16.mxu1 %v2030_v0  ;;  %375 = vmatprep.subr.bf16.mxu0 %v1662_v10  ;;  %v1687_v39 = vld [vmem:[#allocation10 + $0x20] sm:$0xff]   ;;  %v1689_v41 = vld [vmem:[#allocation10 + $0x18] sm:$0xff]   ;;  %v1691_v52 = vld [vmem:[#allocation10 + $0x10] sm:$0xff]  }
  0x5a   :  { %v1473_v42 = vld [vmem:[%s2212_s4] ss:$0 sm:$0xff]  ;;  %v1692_v53 = vld [vmem:[#allocation10 + $0x48] sm:$0xff]   ;;  %v1694_v55 = vld [vmem:[#allocation10 + $0x40] sm:$0xff]  }
  0x5b   :  { %376 = vmatpush1.bf16.msra.mxu0 %v1664_v11  ;;  %v1693_v54 = vld [vmem:[#allocation10 + $0x8] sm:$0xff]   ;;  %v1695_v56 = vld [vmem:[#allocation10] sm:$0xff]   ;;  %v1698_v58 = vld [vmem:[#allocation11 + $0x234] ss:$40 sps:$4 sm:$0xff]  }
  0x5c   :  { %1629 = vmatpush3.bf16.msra.mxu1 %v1655_v5  ;;  %377 = vmatprep.subr.bf16.mxu0 %v1665_v12  ;;  %v1701_v59 = vld [vmem:[#allocation11 + $0x23c] ss:$40 sps:$4 sm:$0xff]   ;;  %v1702_v61 = vld [vmem:[#allocation11 + $0x1e0] ss:$40 sps:$4 sm:$0xff]   ;;  %v1708_v63 = vld [vmem:[#allocation11 + $0x190] ss:$40 sps:$4 sm:$0xff]  }
  0x5d   :  { %1596 = vmatprep.subr.bf16.mxu1 %v1680_v32  ;;  %v1704_v60 = vld [vmem:[#allocation11 + $0x1e4] ss:$40 sps:$4 sm:$0xff]   ;;  %v1710_v62 = vld [vmem:[#allocation11 + $0x194] ss:$40 sps:$4 sm:$0xff]   ;;  %v1714_v1 = vld [vmem:[#allocation11 + $0x140] ss:$40 sps:$4 sm:$0xff]  }
  0x5e   :  { %v1716_v0 = vld [vmem:[#allocation11 + $0x144] ss:$40 sps:$4 sm:$0xff]   ;;  %v1722_v2 = vld [vmem:[#allocation11 + $0xf4] ss:$40 sps:$4 sm:$0xff]   ;;  %v1720_v3 = vld [vmem:[#allocation11 + $0xf0] ss:$40 sps:$4 sm:$0xff]  }
  0x5f   :  { %378 = vmatpush1.bf16.msra.mxu0 %v1667_v13  ;;  %v2138_v5 = vshrl.u32 %v281_v4, 7  ;;  %v279_v7 = vld [vmem:[%s2214_s6] sm:$0x3]  ;;  %v1723_v32 = vld [vmem:[#allocation11 + $0xf8] ss:$40 sps:$4 sm:$0xff]  }
  0x60   :  { %379 = vmatprep.subr.bf16.mxu0 %v1668_v14  ;;  %v1767_v4 = vld [vmem:[#allocation11 + $0x15c] ss:$40 sps:$4 sm:$0xff]  }
  0x61   :  { %v2141_v6 = vsub.s32 0, %v2138_v5  ;;  %v2147_v8 = vsub.s32 1, %v2138_v5 }
  0x63   :  { %380 = vmatpush1.bf16.msra.mxu0 %v1670_v15  ;;  %v284_v9 = vrot.slane %v279_v7, %v2141_v6  ;;  %v288_v10 = vrot.slane %v279_v7, %v2147_v8  ;;  %v1762_v7 = vld [vmem:[#allocation11 + $0x150] ss:$40 sps:$4 sm:$0xff]  }
  0x64   :  { %381 = vmatprep.subr.bf16.mxu0 %v1671_v16 }
  0x67   :  { %382 = vmatpush1.bf16.msra.mxu0 %v1673_v17 }
  0x68   :  { %383 = vmatprep.subr.bf16.mxu0 %v1674_v27  ;;  %v1711_v27 = vld [vmem:[#allocation11 + $0x198] ss:$40 sps:$4 sm:$0xff]  }
  0x6b   :  { %384 = vmatpush1.bf16.msra.mxu0 %v1676_v28  ;;  %v1719_v28 = vld [vmem:[#allocation11 + $0x14c] ss:$40 sps:$4 sm:$0xff]  }
  0x6c   :  { %385 = vmatprep.subr.bf16.mxu0 %v1677_v29  ;;  %v1717_v29 = vld [vmem:[#allocation11 + $0x148] ss:$40 sps:$4 sm:$0xff]  }
  0x6f   :  { %386 = vmatpush1.bf16.msra.mxu0 %v1679_v30  ;;  %v1725_v30 = vld [vmem:[#allocation11 + $0xfc] ss:$40 sps:$4 sm:$0xff]  }
  0x70   :  { %1130 = vmatprep.subr.bf16.mxu0 %v1698_v58 }
 0x117   :  { %v185_v19 = vpop.f32.mrf.mxu1 }
 0x118   :  { %v186_v20 = vadd.f32 %v1469_v18, %v185_v19 }
 0x119   :  { %v1624_v21 = vpop.f32.mrf.mxu1 }
 0x11a   :  { %v191_v22 = vmul.f32 0.01, %v186_v20 }
 0x11b   :  { %v188_v23 = vpop.f32.mrf.mxu1 }
 0x11c   :  { %v192_v24 = vmax.f32 %v186_v20, %v191_v22  ;;  %v1699_v22 = vld [vmem:[#allocation11 + $0x238] ss:$40 sps:$4 sm:$0xff]  }
 0x11d   :  { %v1625_v25 = vpop.f32.mrf.mxu1 }
 0x11e   :  { %v193_v26 = vpack.c.bf16 %v192_v24, %v192_v24  ;;  %v1707_v24 = vld [vmem:[#allocation11 + $0x1ec] ss:$40 sps:$4 sm:$0xff]   ;;  %v1705_v25 = vld [vmem:[#allocation11 + $0x1e8] ss:$40 sps:$4 sm:$0xff]  }
 0x120   :  { %1631 = vmatmul.mubr.msk.bf16.vlgmr.msra.gmra.mxu1 %vm147_vm1, %v193_v26  ;;  %v1713_v26 = vld [vmem:[#allocation11 + $0x19c] ss:$40 sps:$4 sm:$0xff]  }
 0x121   :  { %1597 = vmatpush3.bf16.msra.mxu1 %v1681_v33  ;;  %v1728_v33 = vld [vmem:[#allocation11 + $0xa4] ss:$40 sps:$4 sm:$0xff]  }
 0x122   :  { %1598 = vmatprep.subr.bf16.mxu1 %v1682_v34  ;;  %v1731_v34 = vld [vmem:[#allocation11 + $0xac] ss:$40 sps:$4 sm:$0xff]  }
 0x125   :  { %1599 = vmatpush3.bf16.msra.mxu1 %v1683_v35  ;;  %v1726_v35 = vld [vmem:[#allocation11 + $0xa0] ss:$40 sps:$4 sm:$0xff]  }
 0x126   :  { %1600 = vmatprep.subr.bf16.mxu1 %v1684_v36  ;;  %v1729_v36 = vld [vmem:[#allocation11 + $0xa8] ss:$40 sps:$4 sm:$0xff]  }
 0x129   :  { %1601 = vmatpush3.bf16.msra.mxu1 %v1685_v37  ;;  %v1734_v37 = vld [vmem:[#allocation11 + $0x54] ss:$40 sps:$4 sm:$0xff]  }
 0x12a   :  { %1602 = vmatprep.subr.bf16.mxu1 %v1686_v38  ;;  %v1737_v38 = vld [vmem:[#allocation11 + $0x5c] ss:$40 sps:$4 sm:$0xff]  }
 0x12d   :  { %1603 = vmatpush3.bf16.msra.mxu1 %v1687_v39  ;;  %v1732_v39 = vld [vmem:[#allocation11 + $0x50] ss:$40 sps:$4 sm:$0xff]  }
 0x12e   :  { %1604 = vmatprep.subr.bf16.mxu1 %v1688_v40  ;;  %v1735_v40 = vld [vmem:[#allocation11 + $0x58] ss:$40 sps:$4 sm:$0xff]  }
 0x131   :  { %1605 = vmatpush3.bf16.msra.mxu1 %v1689_v41  ;;  %v1740_v41 = vld [vmem:[#allocation11 + $0x4] ss:$40 sps:$4 sm:$0xff]  }
 0x132   :  { %1606 = vmatprep.subr.bf16.mxu1 %v1690_v51 }
 0x135   :  { %1607 = vmatpush3.bf16.msra.mxu1 %v1691_v52 }
 0x136   :  { %1608 = vmatprep.subr.bf16.mxu1 %v1692_v53 }
 0x139   :  { %1609 = vmatpush3.bf16.msra.mxu1 %v1693_v54 }
 0x13a   :  { %1610 = vmatprep.subr.bf16.mxu1 %v1694_v55 }
 0x13d   :  { %1611 = vmatpush3.bf16.msra.mxu1 %v1695_v56  ;;  %v1744_v56 = vld [vmem:[#allocation11 + $0x240] ss:$40 sps:$4 sm:$0xff]  }
 0x13e   :  { %1171 = vmatprep.subr.bf16.mxu1 %v1701_v59  ;;  %v1752_v59 = vld [vmem:[#allocation11 + $0x1f4] ss:$40 sps:$4 sm:$0xff]  }
 0x1e0   :  { %v254_v43 = vpop.f32.mrf.mxu1 }
 0x1e1   :  { %v255_v44 = vadd.f32 %v1473_v42, %v254_v43  ;;  %v1743_v42 = vld [vmem:[#allocation11 + $0xc] ss:$40 sps:$4 sm:$0xff]   ;;  %v1738_v43 = vld [vmem:[#allocation11] ss:$40 sps:$4 sm:$0xff]  }
 0x1e2   :  { %v1632_v45 = vpop.f32.mrf.mxu1 }
 0x1e3   :  { %v260_v46 = vmul.f32 0.01, %v255_v44  ;;  %v1746_v45 = vld [vmem:[#allocation11 + $0x244] ss:$40 sps:$4 sm:$0xff]  }
 0x1e4   :  { %v257_v47 = vpop.f32.mrf.mxu1 }
 0x1e5   :  { %v261_v48 = vmax.f32 %v255_v44, %v260_v46  ;;  %v1741_v44 = vld [vmem:[#allocation11 + $0x8] ss:$40 sps:$4 sm:$0xff]   ;;  %v1749_v46 = vld [vmem:[#allocation11 + $0x24c] ss:$40 sps:$4 sm:$0xff]  }
 0x1e6   :  { %v1633_v49 = vpop.f32.mrf.mxu1 }
 0x1e7   :  { %v262_v50 = vpack.c.bf16 %v261_v48, %v261_v48  ;;  %v1493_v48 = vld [vmem:[%s2216_s8] ss:$0 sm:$0xff] }
 0x1e9   :  { %404 = vmatmul.mubr.bf16.vlgmr.msra.gmra.mxu0 %v262_v50 }
 0x1ea   :  { %1162 = vmatprep.mubr.bf16.mxu0 %v2032_v31  ;;  %1131 = vmatpush1.bf16.msra.mxu0 %v1696_v57  ;;  %v1747_v57 = vld [vmem:[#allocation11 + $0x248] ss:$40 sps:$4 sm:$0xff]  }
 0x1eb   :  { %1132 = vmatprep.subr.bf16.mxu0 %v1704_v60  ;;  %v1755_v60 = vld [vmem:[#allocation11 + $0x1fc] ss:$40 sps:$4 sm:$0xff]  }
 0x1ee   :  { %1133 = vmatpush1.bf16.msra.mxu0 %v1702_v61  ;;  %v1750_v61 = vld [vmem:[#allocation11 + $0x1f0] ss:$40 sps:$4 sm:$0xff]  }
 0x1ef   :  { %1134 = vmatprep.subr.bf16.mxu0 %v1710_v62  ;;  %v1753_v62 = vld [vmem:[#allocation11 + $0x1f8] ss:$40 sps:$4 sm:$0xff]  }
 0x1f2   :  { %1135 = vmatpush1.bf16.msra.mxu0 %v1708_v63  ;;  %v1758_v63 = vld [vmem:[#allocation11 + $0x1a4] ss:$40 sps:$4 sm:$0xff]  }
 0x1f3   :  { %1136 = vmatprep.subr.bf16.mxu0 %v1716_v0  ;;  %v1761_v0 = vld [vmem:[#allocation11 + $0x1ac] ss:$40 sps:$4 sm:$0xff]  }
 0x1f6   :  { %1137 = vmatpush1.bf16.msra.mxu0 %v1714_v1  ;;  %v1756_v1 = vld [vmem:[#allocation11 + $0x1a0] ss:$40 sps:$4 sm:$0xff]  }
 0x1f7   :  { %1138 = vmatprep.subr.bf16.mxu0 %v1722_v2  ;;  %v1759_v2 = vld [vmem:[#allocation11 + $0x1a8] ss:$40 sps:$4 sm:$0xff]  }
 0x1fa   :  { %1139 = vmatpush1.bf16.msra.mxu0 %v1720_v3  ;;  %v1764_v3 = vld [vmem:[#allocation11 + $0x154] ss:$40 sps:$4 sm:$0xff]  }
 0x1fb   :  { %1140 = vmatprep.subr.bf16.mxu0 %v1728_v33  ;;  %v1803_v33 = vld [vmem:[#allocation11 + $0x164] ss:$40 sps:$4 sm:$0xff]  }
 0x1fe   :  { %1141 = vmatpush1.bf16.msra.mxu0 %v1726_v35  ;;  %v1806_v35 = vld [vmem:[#allocation11 + $0x114] ss:$40 sps:$4 sm:$0xff]  }
 0x1ff   :  { %1142 = vmatprep.subr.bf16.mxu0 %v1734_v37  ;;  %v1809_v37 = vld [vmem:[#allocation11 + $0xc4] ss:$40 sps:$4 sm:$0xff]  }
 0x202   :  { %1143 = vmatpush1.bf16.msra.mxu0 %v1732_v39  ;;  %v1812_v39 = vld [vmem:[#allocation11 + $0x74] ss:$40 sps:$4 sm:$0xff]  }
 0x203   :  { %1144 = vmatprep.subr.bf16.mxu0 %v1740_v41  ;;  %v1813_v41 = vld [vmem:[#allocation11 + $0x20] ss:$40 sps:$4 sm:$0xff]  }
 0x206   :  { %1145 = vmatpush1.bf16.msra.mxu0 %v1738_v43  ;;  %v2169_v43 = vld [vmem:[%s2218_s10] sm:$0xff] }
 0x207   :  { %1212 = vmatprep.subr.bf16.mxu0 %v1746_v45  ;;  %v683_v45 = vrot.slane %v2169_v43, %v2141_v6 }
 0x2a9   :  { %v405_v11 = vpop.f32.mrf.mxu0 }
 0x2aa   :  { %v406_v12 = vadd.f32 %v405_v11, %v284_v9  ;;  %v1765_v9 = vld [vmem:[#allocation11 + $0x158] ss:$40 sps:$4 sm:$0xff]   ;;  %v1773_v11 = vld [vmem:[#allocation11 + $0x10c] ss:$40 sps:$4 sm:$0xff]  }
 0x2ab   :  { %v407_v13 = vpop.f32.mrf.mxu0 }
 0x2ac   :  { %v412_v14 = vmul.f32 0.01, %v406_v12  ;;  %v408_v15 = vadd.f32 %v407_v13, %v288_v10  ;;  %v1770_v10 = vld [vmem:[#allocation11 + $0x104] ss:$40 sps:$4 sm:$0xff]   ;;  %v1771_v13 = vld [vmem:[#allocation11 + $0x108] ss:$40 sps:$4 sm:$0xff]  }
 0x2ad   :  { %v409_v16 = vpop.f32.mrf.mxu0 }
 0x2ae   :  { %v413_v17 = vmul.f32 0.01, %v408_v15  ;;  %v414_v18 = vmax.f32 %v406_v12, %v412_v14  ;;  %v1768_v12 = vld [vmem:[#allocation11 + $0x100] ss:$40 sps:$4 sm:$0xff]   ;;  %v1776_v14 = vld [vmem:[#allocation11 + $0xb4] ss:$40 sps:$4 sm:$0xff]  }
 0x2af   :  { %v410_v19 = vpop.f32.mrf.mxu0  ;;  %v1774_v16 = vld [vmem:[#allocation11 + $0xb0] ss:$40 sps:$4 sm:$0xff]  }
 0x2b0   :  { %v415_v20 = vmax.f32 %v408_v15, %v413_v17  ;;  %v416_v23 = vpack.c.bf16 %v414_v18, %v414_v18  ;;  %v1779_v15 = vld [vmem:[#allocation11 + $0xbc] ss:$40 sps:$4 sm:$0xff]   ;;  %v1777_v17 = vld [vmem:[#allocation11 + $0xb8] ss:$40 sps:$4 sm:$0xff]   ;;  %v1785_v19 = vld [vmem:[#allocation11 + $0x6c] ss:$40 sps:$4 sm:$0xff]  }
 0x2b1   :  { %v1782_v18 = vld [vmem:[#allocation11 + $0x64] ss:$40 sps:$4 sm:$0xff]  }
 0x2b2   :  { %v417_v21 = vpack.c.bf16 %v415_v20, %v415_v20  ;;  %v1780_v20 = vld [vmem:[#allocation11 + $0x60] ss:$40 sps:$4 sm:$0xff]  }
 0x2b4   :  { %585 = vmatprep.mubr.bf16.mxu1 %v417_v21  ;;  %v1783_v21 = vld [vmem:[#allocation11 + $0x68] ss:$40 sps:$4 sm:$0xff]  }
 0x2b5   :  { %586 = vmatmul.mubr.bf16.vlgmr.msra.gmra.mxu1 %v416_v23  ;;  %v1791_v23 = vld [vmem:[#allocation11 + $0x1c] ss:$40 sps:$4 sm:$0xff]  }
 0x2b6   :  { %1172 = vmatpush1.bf16.msra.mxu1 %v1699_v22  ;;  %1203 = vmatprep.mubr.bf16.mxu1 %v2032_v31  ;;  %v1788_v22 = vld [vmem:[#allocation11 + $0x14] ss:$40 sps:$4 sm:$0xff]  }
 0x2b7   :  { %1173 = vmatprep.subr.bf16.mxu1 %v1707_v24  ;;  %v1786_v24 = vld [vmem:[#allocation11 + $0x10] ss:$40 sps:$4 sm:$0xff]  }
 0x2ba   :  { %1174 = vmatpush1.bf16.msra.mxu1 %v1705_v25  ;;  %v1789_v25 = vld [vmem:[#allocation11 + $0x18] ss:$40 sps:$4 sm:$0xff]  }
 0x2bb   :  { %1175 = vmatprep.subr.bf16.mxu1 %v1713_v26  ;;  %v1794_v26 = vld [vmem:[#allocation11 + $0x254] ss:$40 sps:$4 sm:$0xff]  }
 0x2be   :  { %1176 = vmatpush1.bf16.msra.mxu1 %v1711_v27  ;;  %v1792_v27 = vld [vmem:[#allocation11 + $0x250] ss:$40 sps:$4 sm:$0xff]  }
 0x2bf   :  { %1177 = vmatprep.subr.bf16.mxu1 %v1719_v28  ;;  %v1797_v28 = vld [vmem:[#allocation11 + $0x204] ss:$40 sps:$4 sm:$0xff]  }
 0x2c2   :  { %1178 = vmatpush1.bf16.msra.mxu1 %v1717_v29  ;;  %v1795_v29 = vld [vmem:[#allocation11 + $0x200] ss:$40 sps:$4 sm:$0xff]  }
 0x2c3   :  { %1179 = vmatprep.subr.bf16.mxu1 %v1725_v30  ;;  %v1800_v30 = vld [vmem:[#allocation11 + $0x1b4] ss:$40 sps:$4 sm:$0xff]  }
 0x2c6   :  { %1180 = vmatpush1.bf16.msra.mxu1 %v1723_v32  ;;  %v1798_v32 = vld [vmem:[#allocation11 + $0x1b0] ss:$40 sps:$4 sm:$0xff]  }
 0x2c7   :  { %1181 = vmatprep.subr.bf16.mxu1 %v1731_v34  ;;  %v1801_v34 = vld [vmem:[#allocation11 + $0x160] ss:$40 sps:$4 sm:$0xff]  }
 0x2ca   :  { %1182 = vmatpush1.bf16.msra.mxu1 %v1729_v36  ;;  %v1804_v36 = vld [vmem:[#allocation11 + $0x110] ss:$40 sps:$4 sm:$0xff]  }
 0x2cb   :  { %1183 = vmatprep.subr.bf16.mxu1 %v1737_v38  ;;  %v1807_v38 = vld [vmem:[#allocation11 + $0xc0] ss:$40 sps:$4 sm:$0xff]  }
 0x2ce   :  { %1184 = vmatpush1.bf16.msra.mxu1 %v1735_v40  ;;  %v1815_v40 = vld [vmem:[#allocation11 + $0x24] ss:$40 sps:$4 sm:$0xff]  }
 0x2cf   :  { %1185 = vmatprep.subr.bf16.mxu1 %v1743_v42  ;;  %v690_v42 = vsub.s32 2, %v2138_v5 }
 0x2d2   :  { %1186 = vmatpush1.bf16.msra.mxu1 %v1741_v44  ;;  %v694_v44 = vsub.s32 3, %v2138_v5 }
 0x2d3   :  { %1253 = vmatprep.subr.bf16.mxu1 %v1749_v46  ;;  %v691_v46 = vrot.slane %v2169_v43, %v690_v42  ;;  %v702_v42 = vsub.s32 5, %v2138_v5 }
 0x375   :  { %v1612_v47 = vpop.f32.mrf.mxu1 }
 0x377   :  { %v1613_v49 = vpop.f32.mrf.mxu1 }
 0x378   :  { %v1614_v50 = vadd.f32 %v1613_v49, %v1612_v47  ;;  %v687_v47 = vrot.slane %v2169_v43, %v2147_v8 }
 0x379   :  { %v1615_v51 = vpop.f32.mrf.mxu1 }
 0x37a   :  { %v588_v52 = vadd.f32 %v1614_v50, %v1493_v48  ;;  %v695_v48 = vrot.slane %v2169_v43, %v694_v44  ;;  %v706_v44 = vsub.s32 6, %v2138_v5 }
 0x37b   :  { %v1616_v53 = vpop.f32.mrf.mxu1 }
 0x37c   :  { %v593_v54 = vmul.f32 0.01, %v588_v52 }
 0x37e   :  { %v594_v55 = vmax.f32 %v588_v52, %v593_v54 }
 0x380   :  { %v2155_v58 = vpack.c.bf16 %v594_v55, %v594_v55 }
 0x382   :  { %1163 = vmatmul.mubr.bf16.vlgmr.msra.gmra.mxu0 %v2155_v58  ;;  %1204 = vmatmul.mubr.bf16.vlgmr.msra.gmra.mxu1 %v2155_v58 }
 0x383   :  { %1213 = vmatpush1.bf16.msra.mxu0 %v1744_v56  ;;  %1254 = vmatpush1.bf16.msra.mxu1 %v1747_v57 }
 0x384   :  { %1214 = vmatprep.subr.bf16.mxu0 %v1752_v59  ;;  %1255 = vmatprep.subr.bf16.mxu1 %v1755_v60 }
 0x385   :  { %1244 = vmatprep.mubr.bf16.mxu0 %v2032_v31  ;;  %1285 = vmatprep.mubr.bf16.mxu1 %v2032_v31 }
 0x387   :  { %1215 = vmatpush1.bf16.msra.mxu0 %v1750_v61  ;;  %1256 = vmatpush1.bf16.msra.mxu1 %v1753_v62 }
 0x388   :  { %1216 = vmatprep.subr.bf16.mxu0 %v1758_v63  ;;  %1257 = vmatprep.subr.bf16.mxu1 %v1761_v0 }
 0x38b   :  { %1217 = vmatpush1.bf16.msra.mxu0 %v1756_v1  ;;  %1258 = vmatpush1.bf16.msra.mxu1 %v1759_v2 }
 0x38c   :  { %1218 = vmatprep.subr.bf16.mxu0 %v1764_v3  ;;  %1259 = vmatprep.subr.bf16.mxu1 %v1767_v4 }
 0x38f   :  { %1219 = vmatpush1.bf16.msra.mxu0 %v1762_v7  ;;  %1260 = vmatpush1.bf16.msra.mxu1 %v1765_v9 }
 0x390   :  { %1220 = vmatprep.subr.bf16.mxu0 %v1770_v10  ;;  %1261 = vmatprep.subr.bf16.mxu1 %v1773_v11 }
 0x393   :  { %1221 = vmatpush1.bf16.msra.mxu0 %v1768_v12  ;;  %1262 = vmatpush1.bf16.msra.mxu1 %v1771_v13 }
 0x394   :  { %1222 = vmatprep.subr.bf16.mxu0 %v1776_v14  ;;  %1263 = vmatprep.subr.bf16.mxu1 %v1779_v15 }
 0x397   :  { %1223 = vmatpush1.bf16.msra.mxu0 %v1774_v16  ;;  %1264 = vmatpush1.bf16.msra.mxu1 %v1777_v17  ;;  %v698_v16 = vsub.s32 4, %v2138_v5 }
 0x398   :  { %1224 = vmatprep.subr.bf16.mxu0 %v1782_v18  ;;  %1265 = vmatprep.subr.bf16.mxu1 %v1785_v19  ;;  %v2033_v18 = vmov 1983009808  }
 0x399   :  { %v699_v17 = vrot.slane %v2169_v43, %v698_v16  ;;  %v1368_v19 = vunpack.c.l.s4 %v2033_v18 }
 0x39b   :  { %1225 = vmatpush1.bf16.msra.mxu0 %v1780_v20  ;;  %1266 = vmatpush1.bf16.msra.mxu1 %v1783_v21 }
 0x39c   :  { %1226 = vmatprep.subr.bf16.mxu0 %v1788_v22  ;;  %1267 = vmatprep.subr.bf16.mxu1 %v1791_v23  ;;  %v1369_v23 = vunpack.c.0.s8 %v1368_v19 }
 0x39f   :  { %1227 = vmatpush1.bf16.msra.mxu0 %v1786_v24  ;;  %1268 = vmatpush1.bf16.msra.mxu1 %v1789_v25 }
 0x3a0   :  { %1294 = vmatprep.subr.bf16.mxu0 %v1794_v26 }
 0x3a2   :  { %1245 = vmatmul.mubr.bf16.vlgmr.msra.gmra.mxu0 %v2155_v58  ;;  %1286 = vmatmul.mubr.bf16.vlgmr.msra.gmra.mxu1 %v2155_v58 }
 0x3a3   :  { %1295 = vmatpush1.bf16.msra.mxu0 %v1792_v27  ;;  %1326 = vmatprep.mubr.bf16.mxu0 %v2032_v31  ;;  %v1810_v31 = vld [vmem:[#allocation11 + $0x70] ss:$40 sps:$4 sm:$0xff]  }
 0x3a4   :  { %1296 = vmatprep.subr.bf16.mxu0 %v1797_v28 }
 0x3a7   :  { %1297 = vmatpush1.bf16.msra.mxu0 %v1795_v29 }
 0x3a8   :  { %1298 = vmatprep.subr.bf16.mxu0 %v1800_v30 }
 0x3ab   :  { %1299 = vmatpush1.bf16.msra.mxu0 %v1798_v32 }
 0x3ac   :  { %1300 = vmatprep.subr.bf16.mxu0 %v1803_v33  ;;  %v2181_v33 = vsub.s32 %v1369_v23, %v2138_v5 }
 0x3af   :  { %1301 = vmatpush1.bf16.msra.mxu0 %v1801_v34 }
 0x3b0   :  { %1302 = vmatprep.subr.bf16.mxu0 %v1806_v35 }
 0x3b3   :  { %1303 = vmatpush1.bf16.msra.mxu0 %v1804_v36 }
 0x3b4   :  { %1304 = vmatprep.subr.bf16.mxu0 %v1809_v37 }
 0x3b7   :  { %1305 = vmatpush1.bf16.msra.mxu0 %v1807_v38 }
 0x3b8   :  { %1306 = vmatprep.subr.bf16.mxu0 %v1812_v39 }
 0x3bb   :  { %1307 = vmatpush1.bf16.msra.mxu0 %v1810_v31 }
 0x3bc   :  { %1308 = vmatprep.subr.bf16.mxu0 %v1815_v40 }
 0x3bf   :  { %1309 = vmatpush1.bf16.msra.mxu0 %v1813_v41 }
 0x3c2   :  { %1327 = vmatmul.mubr.bf16.vlgmr.msra.gmra.mxu0 %v2155_v58 }
 0x442   :  { %v1164_v49 = vpop.f32.mrf.mxu0  ;;  %v1205_v50 = vpop.f32.mrf.mxu1 }
 0x443   :  { %v1165_v51 = vadd.f32 %v1164_v49, %v683_v45  ;;  %v1206_v52 = vadd.f32 %v1205_v50, %v691_v46  ;;  %v710_v46 = vsub.s32 7, %v2138_v5  ;;  %v707_v49 = vrot.slane %v2169_v43, %v706_v44 }
 0x444   :  { %v1166_v53 = vpop.f32.mrf.mxu0  ;;  %v1207_v54 = vpop.f32.mrf.mxu1 }
 0x445   :  { %v1335_v55 = vsub.f32 0.0, %v1165_v51  ;;  %v1337_v56 = vsub.f32 0.0, %v1206_v52  ;;  %v1167_v57 = vadd.f32 %v1166_v53, %v687_v47  ;;  %v1208_v58 = vadd.f32 %v1207_v54, %v695_v48  ;;  %v677_v52 = vld [vmem:[%s2218_s10 + $0x8] sm:$0x3]  ;;  %s1966_s10 = scalar_lea.vmem %s1444_s26, 160 }
 0x446   :  { %v1168_v59 = vpop.f32.mrf.mxu0  ;;  %v1209_v60 = vpop.f32.mrf.mxu1  ;;  %v703_v48 = vrot.slane %v2169_v43, %v702_v42  ;;  %v711_v50 = vrot.slane %v2169_v43, %v710_v46  ;;  %v719_v5 = vrot.slane %v677_v52, %v2147_v8  ;;  %p1967_p2 = scmp.ne.s32.totalorder %s1444_s26, %s1966_s10  ;;  %p1972_p4 = scmp.lt.s32.totalorder %s1966_s10, %s1966_s10 }
 0x447   :  { %v1340_v61 = vmul.f32 1.442695, %v1335_v55  ;;  %v1344_v62 = vmul.f32 1.442695, %v1337_v56  ;;  %v1336_v63 = vsub.f32 0.0, %v1167_v57  ;;  %v1338_v0 = vsub.f32 0.0, %v1208_v58 }
 0x448   :  { %v1169_v1 = vpop.f32.mrf.mxu0  ;;  %v1210_v2 = vpop.f32.mrf.mxu1  ;;  %v715_v56 = vrot.slane %v677_v52, %v2141_v6  ;;  %p1973_p5 = por %p1972_p4, %p1971_p3 }
 0x449   :  { %1816 = vpow2.f32 %v1340_v61  ;;  %v1342_v3 = vmul.f32 1.442695, %v1336_v63  ;;  %v1346_v4 = vmul.f32 1.442695, %v1338_v0 }
 0x44a   :  { %1818 = vpow2.f32 %v1344_v62  ;;  %p1974_p6 = pnand %p1973_p5, %p1967_p2 }
 0x44b   :  { %1820 = vpow2.f32 %v1342_v3 }
 0x44c   :  { %1822 = vpow2.f32 %v1346_v4 }
 0x456   :  { %v1817_v7 = vpop.eup %1816 }
 0x457   :  { %v1819_v9 = vpop.eup %1818  ;;  %v1350_v10 = vadd.f32 1.0, %v1817_v7 }
 0x458   :  { %v1821_v11 = vpop.eup %1820  ;;  %v1352_v12 = vadd.f32 1.0, %v1819_v9 }
 0x459   :  { %v1823_v13 = vpop.eup %1822  ;;  %1824 = vrcp.f32 %v1350_v10  ;;  %v1351_v14 = vadd.f32 1.0, %v1821_v11 }
 0x45a   :  { %1826 = vrcp.f32 %v1352_v12  ;;  %v1353_v15 = vadd.f32 1.0, %v1823_v13 }
 0x45b   :  { %1828 = vrcp.f32 %v1351_v14 }
 0x45c   :  { %1830 = vrcp.f32 %v1353_v15 }
 0x462   :  { %v1246_v20 = vpop.f32.mrf.mxu0  ;;  %v1287_v21 = vpop.f32.mrf.mxu1 }
 0x463   :  { %v1247_v22 = vadd.f32 %v1246_v20, %v699_v17  ;;  %v1288_v53 = vadd.f32 %v1287_v21, %v707_v49 }
 0x464   :  { %v1248_v24 = vpop.f32.mrf.mxu0  ;;  %v1289_v25 = vpop.f32.mrf.mxu1 }
 0x465   :  { %v1339_v26 = vsub.f32 0.0, %v1247_v22  ;;  %v1249_v51 = vadd.f32 %v1248_v24, %v703_v48  ;;  %v1290_v54 = vadd.f32 %v1289_v25, %v711_v50  ;;  %v1396_v57 = vmul.f32 1.442695, %v1288_v53 }
 0x466   :  { %v1825_v27 = vpop.eup %1824  ;;  %v1250_v28 = vpop.f32.mrf.mxu0 }
 0x467   :  { %v1291_v29 = vpop.f32.mrf.mxu1  ;;  %v1827_v30 = vpop.eup %1826  ;;  %v1348_v32 = vmul.f32 1.442695, %v1339_v26  ;;  %v1394_v55 = vmul.f32 1.442695, %v1249_v51  ;;  %v1398_v58 = vmul.f32 1.442695, %v1290_v54 }
 0x468   :  { %v1829_v34 = vpop.eup %1828  ;;  %v1251_v35 = vpop.f32.mrf.mxu0 }
 0x469   :  { %v1292_v36 = vpop.f32.mrf.mxu1  ;;  %v1831_v37 = vpop.eup %1830  ;;  %1832 = vpow2.f32 %v1348_v32  ;;  %v1365_v38 = vcombine.low %v1825_v27, %v1829_v34 }
 0x46a   :  { %v1366_v39 = vcombine.low %v1827_v30, %v1831_v37 }
 0x46b   :  { %v1373_v31 = vrot.slane %v1365_v38, %v2181_v33 }
 0x46c   :  { %v1380_v40 = vrot.slane %v1366_v39, %v2181_v33 }
 0x46e   :  { %v1381_v41 = vcombine.low %v1373_v31, %v1380_v40 }
 0x470   :  { %1391 = vst [vmem:[#allocation13] sm:$0xff] %v1381_v41 }
 0x476   :  { %v1833_v45 = vpop.eup %1832 }
 0x477   :  { %v1354_v47 = vadd.f32 1.0, %v1833_v45 }
 0x479   :  { %1834 = vrcp.f32 %v1354_v47 }
 0x47a   :  { %1836 = vpow2.f32 %v1394_v55 }
 0x47b   :  { %1838 = vpow2.f32 %v1396_v57 }
 0x47c   :  { %1840 = vpow2.f32 %v1398_v58 }
 0x482   :  { %v1328_v59 = vpop.f32.mrf.mxu0 }
 0x483   :  { %v1329_v60 = vadd.f32 %v1328_v59, %v715_v56 }
 0x484   :  { %v1330_v61 = vpop.f32.mrf.mxu0 }
 0x485   :  { %v1400_v43 = vmul.f32 1.442695, %v1329_v60  ;;  %v1331_v62 = vadd.f32 %v1330_v61, %v719_v5 }
 0x486   :  { %v1835_v63 = vpop.eup %1834  ;;  %v1332_v0 = vpop.f32.mrf.mxu0 }
 0x487   :  { %1842 = vpow2.f32 %v1400_v43  ;;  %v1402_v1 = vmul.f32 1.442695, %v1331_v62  ;;  %v1388_v6 = vrot.slane %v1835_v63, %v2181_v33 }
 0x488   :  { %v1333_v8 = vpop.f32.mrf.mxu0 }
 0x489   :  { %1844 = vpow2.f32 %v1402_v1  ;;  %1393 = vst.msk [vmem:[#allocation13 + $0x8] sm:$0x3] %vm1392_vm2, %v1388_v6 }
 0x48a   :  { %1977 = shalt.err (!%p1974_p6)
}
 0x48b   :  { %1446 = dma.vmem_to_hbm [thread:$0]  %s1444_s26, 160, %s2219_s11, [#allocation4]   ;;  %v1837_v2 = vpop.eup %1836 }
 0x48c   :  { %v1839_v3 = vpop.eup %1838  ;;  %s2035_s28 = smov [#allocation14]  }
 0x48d   :  { %v1841_v4 = vpop.eup %1840  ;;  %v1409_v7 = vcombine.low %v1837_v2, %v1839_v3  ;;  %s1453_s29 = sshll.u32 %s2035_s28, 4  ;;  %s1454_s29 = int_to_ptr.vmem [resolvable:$true] %s1453_s29 }
 0x48e   :  { %s1986_s11 = scalar_lea.vmem %s1454_s29, 160  ;;  %p1991_p8 = scmp.lt.s32.totalorder %s1454_s29, %s1454_s29 }
 0x48f   :  { %v1417_v12 = vrot.slane %v1409_v7, %v2181_v33  ;;  %p1987_p7 = scmp.ne.s32.totalorder %s1454_s29, %s1986_s11  ;;  %p1992_p9 = scmp.lt.s32.totalorder %s1986_s11, %s1986_s11 }
 0x491   :  { %p1993_p10 = por %p1992_p9, %p1991_p8 }
 0x493   :  { %p1994_p11 = pnand %p1993_p10, %p1987_p7 }
 0x494   :  { %v1843_v9 = vpop.eup %1842 }
 0x495   :  { %v1410_v10 = vcombine.low %v1841_v4, %v1843_v9 }
 0x496   :  { %v1845_v11 = vpop.eup %1844 }
 0x497   :  { %v1424_v13 = vrot.slane %v1410_v10, %v2181_v33  ;;  %v1432_v14 = vrot.slane %v1845_v11, %v2181_v33 }
 0x499   :  { %v1425_v15 = vcombine.low %v1417_v12, %v1424_v13  ;;  %1436 = vst.msk [vmem:[#allocation14 + $0x8] sm:$0x3] %vm1392_vm2, %v1432_v14 }
 0x49b   :  { %1435 = vst [vmem:[#allocation14] sm:$0xff] %v1425_v15 }
 0x49c   :  { %1997 = shalt.err (!%p1994_p11)
}
 0x49d   :  { %1456 = dma.vmem_to_hbm [thread:$0]  %s1454_s29, 160, %s2220_s12, [#allocation15]  }
 0x49e   :  { %2014 = dma.done.wait [#allocation4], 160  }
 0x49f   :  { %2015 = vsyncadd [#allocation4], 4294967136 }
 0x4a0   :  { %2016 = dma.done.wait [#allocation15], 160  }
 0x4a1   :  { %2017 = vsyncadd [#allocation15], 4294967136 }
 0x4a2   :  { %1463 = vsyncpa [#allocation3], 1 }
 0x4a3   :  { %1464 = vsyncpa [#allocation6], 1 }
 0x4a4   :  { %1465 = vsyncpa [#allocation9], 1 }
 0x4a5   :  { %1466 = vsyncpa [#allocation12], 1 }
 0x4a6   :  { %1467 = vsyncpa [#allocation4], 1 }
 0x4a7   :  { %1468 = vsyncpa [#allocation15], 1 }

</bundles_post_ra>
